<compile_context>
chip_gen: v7x
topology: tpu7x:2x2x1
jax: 0.10.0
libtpu: 0.0.40
codegen_flags: <defaults>
</compile_context>

<pallas_src>
import functools

import jax
import jax.numpy as jnp
import numpy as np
from jax.experimental import pallas as pl
from jax.experimental.pallas import tpu as pltpu

_MIB = 2 ** 20


def _round_up(x, m):
    return (x + m - 1) // m * m


def _vmem_budget_bytes():
    """Usable per-core VMEM budget: chip capacity minus headroom."""
    try:
        cap = int(pltpu.get_tpu_info().vmem_capacity_bytes)
    except Exception:
        cap = 64 * _MIB  # conservative default: v7x per-TensorCore capacity
    return max(16 * _MIB, min(int(cap * 0.75), cap - 16 * _MIB))


def _select_tiles(U_p128, G_p, E, budget, x_bytes, m_bytes, out_bytes):
    """Budget-driven (e_tile, u_tile): prefer lane-dense E tiles, then big U tiles."""
    E_p128 = max(_round_up(E, 128), 128)

    # Lane-dense E tile, capped by VMEM budget class; allow 1024 only on
    # large-VMEM parts (v5e/v6e).  Keep >=2 E steps when E allows it so both
    # v7x TensorCores get work on the "parallel" axis.
    e_cap = 1024 if budget >= 80 * _MIB else 512
    if E_p128 >= 256:
        e_cap = min(e_cap, max(128, (E_p128 // 2) // 128 * 128))
    else:
        e_cap = 128
    e_opts = [t for t in (1024, 512, 256, 128) if t <= e_cap]

    u_opts = [u for u in (4096, 2048, 1024, 512, 256, 128) if u <= U_p128]
    if not u_opts:
        u_opts = [128]

    for e_tile in e_opts:
        for u_tile in u_opts:
            n_k = max(1, -(-U_p128 // u_tile))
            m_buf = 1 if n_k == 1 else 2
            est = (2 * u_tile * e_tile * x_bytes        # X double-buffered
                   + m_buf * G_p * u_tile * m_bytes     # M tile
                   + 2 * G_p * e_tile * out_bytes       # output double-buffered
                   + G_p * e_tile * 4)                  # f32 accumulator scratch
            if int(est * 1.25) + 2 * _MIB <= budget:
                return e_tile, u_tile
    return 128, 128


# --------------------------------------------------------------------------
# Pre-pass kernel: M = W * (I + A + ... + A^layers)
# --------------------------------------------------------------------------
def _fold_groups_kernel(a_ref, members_ref, mask_ref, m_ref, *,
                        layers, n_users, group_len):
    a = a_ref[...]                                  # (U_p, U_p) f32
    members = members_ref[...]                      # (G_p, L)  int32
    mask = mask_ref[...]                            # (G_p, L)  f32
    n_groups = members.shape[0]

    # W[b,u] = sum_l mask[b,l] * [members[b,l] == u]  (jnp.where avoids the
    # int->f32 cast + multiply per element).
    # TODO(synk): wrap in lax.fori_loop(..., unroll=True) if group_len gets large.
    u_iota = jax.lax.broadcasted_iota(jnp.int32, (n_groups, n_users), 1)
    w = jnp.zeros((n_groups, n_users), jnp.float32)
    for l in range(group_len):
        w = w + jnp.where(members[:, l:l + 1] == u_iota, mask[:, l:l + 1], 0.0)

    # M = W + W@A + W@A^2 + ...  (tiny f32 matmuls, full-precision propagation)
    m = w
    t = w
    for _ in range(layers):
        t = jnp.dot(t, a, preferred_element_type=jnp.float32)
        m = m + t
    m_ref[...] = m.astype(m_ref.dtype)              # emit directly in MXU dtype


def _compute_m_pallas(a, mem, msk, *, layers, U_p, G_p, L, m_dtype, vmem_limit):
    kernel = functools.partial(_fold_groups_kernel,
                               layers=layers, n_users=U_p, group_len=L)
    return pl.pallas_call(
        kernel,
        out_shape=jax.ShapeDtypeStruct((G_p, U_p), m_dtype),
        grid_spec=pltpu.PrefetchScalarGridSpec(
            num_scalar_prefetch=0,
            grid=(1,),
            in_specs=[
                pl.BlockSpec((U_p, U_p), lambda i: (0, 0)),   # overlap_user
                pl.BlockSpec((G_p, L), lambda i: (0, 0)),     # members
                pl.BlockSpec((G_p, L), lambda i: (0, 0)),     # mask
            ],
            out_specs=pl.BlockSpec((G_p, U_p), lambda i: (0, 0)),
        ),
        compiler_params=pltpu.CompilerParams(
            dimension_semantics=("arbitrary",),
            vmem_limit_bytes=int(vmem_limit)),
    )(a, mem, msk)


def _compute_m_xla(a, mem, msk, *, layers, U_p, m_dtype):
    # VMEM-guard fallback for very large U: the pre-pass is off the hot path,
    # so plain XLA is acceptable here.
    # TODO(synk): tile the W*(I+A+...+A^k) polynomial over U columns in Pallas
    # instead of falling back to XLA for very large U.
    onehot = (mem[:, :, None]
              == jnp.arange(U_p, dtype=jnp.int32)[None, None, :]).astype(jnp.float32)
    w = jnp.einsum('gl,glu->gu', msk, onehot)
    m = w
    t = w
    for _ in range(layers):
        t = t @ a
        m = m + t
    return m.astype(m_dtype)


# --------------------------------------------------------------------------
# Hot-path kernel: group_emb = M @ X, tiled over (E, U)
# --------------------------------------------------------------------------
def _group_emb_kernel(m_ref, x_ref, out_ref, acc_ref):
    k = pl.program_id(1)

    @pl.when(k == 0)
    def _():
        acc_ref[...] = jnp.zeros_like(acc_ref)

    acc_ref[...] += jnp.dot(m_ref[...], x_ref[...],
                            preferred_element_type=jnp.float32)

    @pl.when(k == pl.num_programs(1) - 1)
    def _():
        out_ref[...] = acc_ref[...].astype(out_ref.dtype)


def _call_group_emb(m_agg, x, *, G_p, U_p, E_p, u_tile, e_tile, out_dtype,
                    vmem_limit, single_buffer_m):
    n_e = E_p // e_tile
    n_k = U_p // u_tile

    if single_buffer_m and n_k == 1:
        # M is grid-invariant across the E axis; a second pipeline buffer is
        # pure VMEM waste.
        m_spec = pl.BlockSpec((G_p, u_tile), lambda e, k: (0, k),
                              pipeline_mode=pl.Buffered(1))
    else:
        m_spec = pl.BlockSpec((G_p, u_tile), lambda e, k: (0, k))

    return pl.pallas_call(
        _group_emb_kernel,
        out_shape=jax.ShapeDtypeStruct((G_p, E_p), out_dtype),
        grid_spec=pltpu.PrefetchScalarGridSpec(
            num_scalar_prefetch=0,
            grid=(n_e, n_k),                                   # reduction axis last
            in_specs=[
                m_spec,                                        # M tile
                pl.BlockSpec((u_tile, e_tile), lambda e, k: (k, e)),  # X tile
            ],
            out_specs=pl.BlockSpec((G_p, e_tile), lambda e, k: (0, e)),
            scratch_shapes=[pltpu.VMEM((G_p, e_tile), jnp.float32)],
        ),
        compiler_params=pltpu.CompilerParams(
            dimension_semantics=("parallel", "arbitrary"),
            vmem_limit_bytes=int(vmem_limit)),
    )(m_agg, x)


# --------------------------------------------------------------------------
# Wrapper
# --------------------------------------------------------------------------
def social_relationship_agg(users_emb, overlap_user, members_of_group, mask,
                            layers, *, mxu_dtype=jnp.bfloat16):
    U, E = users_emb.shape
    G, L = members_of_group.shape
    assert overlap_user.shape == (U, U)
    assert mask.shape == (G, L)

    out_dtype = users_emb.dtype
    x_bytes = jnp.dtype(mxu_dtype).itemsize
    m_bytes = x_bytes
    out_bytes = jnp.dtype(out_dtype).itemsize

    budget = _vmem_budget_bytes()

    # Layout-friendly zero padding.
    U_p128 = max(_round_up(U, 128), 128)             # lane dim of M / A
    g_align = 16 if x_bytes == 2 else 8              # bf16 min tile sublanes
    G_p = max(_round_up(G, g_align), g_align)

    e_tile, u_tile = _select_tiles(U_p128, G_p, E, budget,
                                   x_bytes, m_bytes, out_bytes)
    U_p = _round_up(U_p128, u_tile)
    E_p = max(_round_up(E, e_tile), e_tile)

    # Cast X upstream (once): halves the dominant HBM->VMEM stream of the
    # HBM-bound hot kernel and removes per-step VPU cast work.
    x = jnp.pad(users_emb, ((0, U_p - U), (0, E_p - E))).astype(mxu_dtype)
    a = jnp.pad(overlap_user.astype(jnp.float32), ((0, U_p - U), (0, U_p - U)))
    mem = jnp.pad(members_of_group.astype(jnp.int32), ((0, G_p - G), (0, 0)))
    msk = jnp.pad(mask.astype(jnp.float32), ((0, G_p - G), (0, 0)))

    # --- Pre-pass: M (G_p, U_p) in MXU dtype, with VMEM-fit guard ---
    est_k1 = 3 * U_p * U_p * 4 + 10 * G_p * U_p * 4 + 4 * G_p * U_p * m_bytes
    if int(est_k1 * 1.25) + 2 * _MIB <= budget:
        m_agg = _compute_m_pallas(a, mem, msk, layers=layers, U_p=U_p, G_p=G_p,
                                  L=L, m_dtype=mxu_dtype, vmem_limit=budget)
    else:
        m_agg = _compute_m_xla(a, mem, msk, layers=layers, U_p=U_p,
                               m_dtype=mxu_dtype)

    # --- Hot path: group_emb = M @ X ---
    kwargs = dict(G_p=G_p, U_p=U_p, E_p=E_p, u_tile=u_tile, e_tile=e_tile,
                  out_dtype=out_dtype, vmem_limit=budget)
    try:
        out_p = _call_group_emb(m_agg, x, single_buffer_m=True, **kwargs)
    except Exception:
        # pl.Buffered(1) unsupported in this JAX build: fall back to defaults.
        out_p = _call_group_emb(m_agg, x, single_buffer_m=False, **kwargs)

    return out_p[:G, :E]


def _reference(users_emb, overlap_user, members_of_group, mask, layers):
    embs = [users_emb]
    x = users_emb
    for _ in range(layers):
        x = overlap_user @ x
        embs.append(x)
    s = jnp.sum(jnp.stack(embs, axis=0), axis=0)
    gathered = s[members_of_group]                 # (G, L, E)
    return jnp.einsum('BL,BLE->BE', mask, gathered)


if __name__ == "__main__":
    # Small deterministic setup.
    U, E, G, L, LAYERS = 16, 256, 8, 4, 2

    key = jax.random.PRNGKey(0)
    k1, k2, k3, k4 = jax.random.split(key, 4)

    users_emb = jax.random.normal(k1, (U, E), dtype=jnp.float32)
    overlap_user = jax.random.uniform(k2, (U, U), dtype=jnp.float32) / U
    members_of_group = jax.random.randint(k3, (G, L), 0, U, dtype=jnp.int32)
    mask = jax.random.uniform(k4, (G, L), dtype=jnp.float32)

    out = social_relationship_agg(users_emb, overlap_user, members_of_group,
                                  mask, LAYERS)
    out = jax.block_until_ready(out)

    ref = _reference(users_emb, overlap_user, members_of_group, mask, LAYERS)
    # bf16 MXU operands in the hot-path matmul => loosened tolerance vs f32 ref.
    # (pass mxu_dtype=jnp.float32 to social_relationship_agg for tighter error.)
    np.testing.assert_allclose(np.asarray(out), np.asarray(ref),
                               rtol=5e-2, atol=5e-2)
    print("KERNEL_OK")
</pallas_src>

<mosaic_0001>
module attributes {stable_mosaic.version = 11 : i64} {
  func.func @_fold_groups_kernel(%arg0: i32, %arg1: memref<128x128xf32, #tpu.memory_space<vmem>>, %arg2: memref<16x4xi32, #tpu.memory_space<vmem>>, %arg3: memref<16x4xf32, #tpu.memory_space<vmem>>, %arg4: memref<16x128xbf16, #tpu.memory_space<vmem>>) attributes {dimension_semantics = [#tpu.dimension_semantics<arbitrary>], iteration_bounds = array<i64: 1>, scalar_prefetch = 0 : i64, scratch_operands = 0 : i64, tpu.core_type = #tpu.core_type<tc>, window_params = [{pipeline_mode = #tpu.pipeline_mode<synchronous>, transform_indices = @transform_0, window_bounds = array<i64: 128, 128>}, {pipeline_mode = #tpu.pipeline_mode<synchronous>, transform_indices = @transform_1, window_bounds = array<i64: 16, 4>}, {pipeline_mode = #tpu.pipeline_mode<synchronous>, transform_indices = @transform_2, window_bounds = array<i64: 16, 4>}, {pipeline_mode = #tpu.pipeline_mode<synchronous>, transform_indices = @transform_3, window_bounds = array<i64: 16, 128>}]} {
    %c0 = arith.constant 0 : index
    %c0_0 = arith.constant 0 : index
    %0 = vector.load %arg1[%c0, %c0_0] : memref<128x128xf32, #tpu.memory_space<vmem>>, vector<128x128xf32>
    %c0_1 = arith.constant 0 : index
    %c0_2 = arith.constant 0 : index
    %1 = vector.load %arg2[%c0_1, %c0_2] : memref<16x4xi32, #tpu.memory_space<vmem>>, vector<16x4xi32>
    %c0_3 = arith.constant 0 : index
    %c0_4 = arith.constant 0 : index
    %2 = vector.load %arg3[%c0_3, %c0_4] : memref<16x4xf32, #tpu.memory_space<vmem>>, vector<16x4xf32>
    %3 = tpu.iota {dimensions = array<i32: 1>} : vector<16x128xi32>
    %cst = arith.constant 0.000000e+00 : f32
    %4 = vector.broadcast %cst : f32 to vector<16x128xf32>
    %5 = vector.extract_strided_slice %1 {offsets = [0, 0], sizes = [16, 1], strides = [1, 1]} : vector<16x4xi32> to vector<16x1xi32>
    %6 = vector.broadcast %5 : vector<16x1xi32> to vector<16x128xi32>
    %7 = arith.cmpi eq, %6, %3 : vector<16x128xi32>
    %8 = vector.extract_strided_slice %2 {offsets = [0, 0], sizes = [16, 1], strides = [1, 1]} : vector<16x4xf32> to vector<16x1xf32>
    %cst_5 = arith.constant 0.000000e+00 : f32
    %9 = vector.shape_cast %8 : vector<16x1xf32> to vector<16x1xf32>
    %10 = vector.broadcast %9 : vector<16x1xf32> to vector<16x128xf32>
    %11 = vector.broadcast %cst_5 : f32 to vector<16x128xf32>
    %12 = arith.select %7, %10, %11 : vector<16x128xi1>, vector<16x128xf32>
    %13 = arith.addf %4, %12 : vector<16x128xf32>
    %14 = vector.extract_strided_slice %1 {offsets = [0, 1], sizes = [16, 1], strides = [1, 1]} : vector<16x4xi32> to vector<16x1xi32>
    %15 = vector.broadcast %14 : vector<16x1xi32> to vector<16x128xi32>
    %16 = arith.cmpi eq, %15, %3 : vector<16x128xi32>
    %17 = vector.extract_strided_slice %2 {offsets = [0, 1], sizes = [16, 1], strides = [1, 1]} : vector<16x4xf32> to vector<16x1xf32>
    %cst_6 = arith.constant 0.000000e+00 : f32
    %18 = vector.shape_cast %17 : vector<16x1xf32> to vector<16x1xf32>
    %19 = vector.broadcast %18 : vector<16x1xf32> to vector<16x128xf32>
    %20 = vector.broadcast %cst_6 : f32 to vector<16x128xf32>
    %21 = arith.select %16, %19, %20 : vector<16x128xi1>, vector<16x128xf32>
    %22 = arith.addf %13, %21 : vector<16x128xf32>
    %23 = vector.extract_strided_slice %1 {offsets = [0, 2], sizes = [16, 1], strides = [1, 1]} : vector<16x4xi32> to vector<16x1xi32>
    %24 = vector.broadcast %23 : vector<16x1xi32> to vector<16x128xi32>
    %25 = arith.cmpi eq, %24, %3 : vector<16x128xi32>
    %26 = vector.extract_strided_slice %2 {offsets = [0, 2], sizes = [16, 1], strides = [1, 1]} : vector<16x4xf32> to vector<16x1xf32>
    %cst_7 = arith.constant 0.000000e+00 : f32
    %27 = vector.shape_cast %26 : vector<16x1xf32> to vector<16x1xf32>
    %28 = vector.broadcast %27 : vector<16x1xf32> to vector<16x128xf32>
    %29 = vector.broadcast %cst_7 : f32 to vector<16x128xf32>
    %30 = arith.select %25, %28, %29 : vector<16x128xi1>, vector<16x128xf32>
    %31 = arith.addf %22, %30 : vector<16x128xf32>
    %32 = vector.extract_strided_slice %1 {offsets = [0, 3], sizes = [16, 1], strides = [1, 1]} : vector<16x4xi32> to vector<16x1xi32>
    %33 = vector.broadcast %32 : vector<16x1xi32> to vector<16x128xi32>
    %34 = arith.cmpi eq, %33, %3 : vector<16x128xi32>
    %35 = vector.extract_strided_slice %2 {offsets = [0, 3], sizes = [16, 1], strides = [1, 1]} : vector<16x4xf32> to vector<16x1xf32>
    %cst_8 = arith.constant 0.000000e+00 : f32
    %36 = vector.shape_cast %35 : vector<16x1xf32> to vector<16x1xf32>
    %37 = vector.broadcast %36 : vector<16x1xf32> to vector<16x128xf32>
    %38 = vector.broadcast %cst_8 : f32 to vector<16x128xf32>
    %39 = arith.select %34, %37, %38 : vector<16x128xi1>, vector<16x128xf32>
    %40 = arith.addf %31, %39 : vector<16x128xf32>
    %cst_9 = arith.constant dense<0.000000e+00> : vector<16x128xf32>
    %41 = tpu.matmul %40, %0, %cst_9 {dimension_numbers = #tpu.dot_dimension_numbers<[1], [0], [0], [1], [0, 0, 1, 1], [], []>} : vector<16x128xf32>, vector<128x128xf32>, vector<16x128xf32> -> vector<16x128xf32>
    %42 = arith.addf %40, %41 : vector<16x128xf32>
    %cst_10 = arith.constant dense<0.000000e+00> : vector<16x128xf32>
    %43 = tpu.matmul %41, %0, %cst_10 {dimension_numbers = #tpu.dot_dimension_numbers<[1], [0], [0], [1], [0, 0, 1, 1], [], []>} : vector<16x128xf32>, vector<128x128xf32>, vector<16x128xf32> -> vector<16x128xf32>
    %44 = arith.addf %42, %43 : vector<16x128xf32>
    %45 = arith.truncf %44 : vector<16x128xf32> to vector<16x128xbf16>
    %c0_11 = arith.constant 0 : index
    %c0_12 = arith.constant 0 : index
    %46 = vector.load %arg4[%c0_11, %c0_12] : memref<16x128xbf16, #tpu.memory_space<vmem>>, vector<16x128xbf16>
    tpu.vector_store %arg4[%c0_11, %c0_12], %45 {strides = array<i32>} : memref<16x128xbf16, #tpu.memory_space<vmem>>, vector<16x128xbf16>,
    return
  }
  func.func @transform_0(%arg0: i32) -> (i32, i32) {
    %c0_i32 = arith.constant 0 : i32
    %c0_i32_0 = arith.constant 0 : i32
    %c0_i32_1 = arith.constant 0 : i32
    return %c0_i32, %c0_i32_0 : i32, i32
  }
  func.func @transform_1(%arg0: i32) -> (i32, i32) {
    %c0_i32 = arith.constant 0 : i32
    %c0_i32_0 = arith.constant 0 : i32
    %c0_i32_1 = arith.constant 0 : i32
    return %c0_i32, %c0_i32_0 : i32, i32
  }
  func.func @transform_2(%arg0: i32) -> (i32, i32) {
    %c0_i32 = arith.constant 0 : i32
    %c0_i32_0 = arith.constant 0 : i32
    %c0_i32_1 = arith.constant 0 : i32
    return %c0_i32, %c0_i32_0 : i32, i32
  }
  func.func @transform_3(%arg0: i32) -> (i32, i32) {
    %c0_i32 = arith.constant 0 : i32
    %c0_i32_0 = arith.constant 0 : i32
    %c0_i32_1 = arith.constant 0 : i32
    return %c0_i32, %c0_i32_0 : i32, i32
  }
}

</mosaic_0001>

<bundles_post_ra>
// kernel: tpu_custom_call.1
= control target key start
LH: loop header
LB: loop body
LE: loop exit
PB: predicated region body
PF: predicated region fallthrough
CT: control target
= control target key end

     0   :  { %8 = vsyncpa [#allocation3], 0  ;;  %s638_s0 = inlined_call_operand.hbm [shape: f32[128,128], index: 0, kind: input, shape index: {}]   ;;  %s639_s1 = inlined_call_operand.vmem [shape: s32[16,4], index: 1, kind: input, shape index: {}]   ;;  %s640_s2 = inlined_call_operand.vmem [shape: f32[16,4], index: 2, kind: input, shape index: {}]   ;;  %s641_s3 = inlined_call_operand.hbm [shape: bf16[16,128], index: 3, kind: output, shape index: {}]  }
   0x1   :  { %9 = vsyncpa [#allocation4], 0  ;;  %s560_s12 = smov [#allocation2]   ;;  %s512_s16 = scalar_lea.hbm %s638_s0, 2048 }
   0x2   :  { %s15_s13 = sshll.u32 %s560_s12, 4  ;;  %p513_p0 = scmp.ne.s32.totalorder %s638_s0, %s512_s16  ;;  %s16_s13 = int_to_ptr.vmem [resolvable:$true] %s15_s13 }
   0x3   :  { %p516_p1 = scmp.lt.u32.totalorder %s512_s16, %s638_s0 }
   0x5   :  { %p518_p2 = pnand %p516_p1, %p513_p0 }
   0x7   :  { %521 = shalt.err (!%p518_p2)
}
   0x8   :  { %s522_s21 = scalar_lea.vmem %s16_s13, 2048  ;;  %p527_p4 = scmp.lt.s32.totalorder %s16_s13, %s16_s13 }
   0x9   :  { %p523_p3 = scmp.ne.s32.totalorder %s16_s13, %s522_s21  ;;  %p528_p5 = scmp.lt.s32.totalorder %s522_s21, %s522_s21 }
   0xb   :  { %p529_p6 = por %p528_p5, %p527_p4 }
   0xd   :  { %p530_p7 = pnand %p529_p6, %p523_p3 }
   0xf   :  { %533 = shalt.err (!%p530_p7)
}
  0x10   :  { %s561_s22 = smov 128   ;;  %s562_s23 = smov 8  }
  0x11   :  { %21 = dma.hbm_to_vmem [thread:$0]  %s638_s0, 2048, %s16_s13, [#allocation3], %s561_s22, %s561_s22, %s562_s23  }
  0x12   :  { %556 = dma.done.wait [#allocation3], 2048  }
  0x13   :  { %557 = vsyncadd [#allocation3], 4294965248  ;;  %v563_v0 = vmov 0   ;;  %v605_v1 = vld [vmem:[%s639_s1 + $0x8] sm:$0xff]  ;;  %v45_v2 = vld [vmem:[%s639_s1] sm:$0xff]  ;;  %v564_v4 = vmov 1   ;;  %v49_v42 = vlaneseq }
  0x14   :  { %505 = vset.pattern.permute.xlu1 %v563_v0  ;;  %503 = vset.pattern.permute.xlu0 %v563_v0  ;;  %v614_v3 = vld [vmem:[%s640_s2] sm:$0xff]  ;;  %v30_v6 = vld [vmem:[#allocation2 + $0x8] sm:$0xff]  ;;  %v31_v8 = vld [vmem:[#allocation2 + $0x10] sm:$0xff]  ;;  %v565_v15 = vmov 2   ;;  %v566_v21 = vmov 3  }
  0x15   :  { %55 = vperm.xlu1 %505, %v605_v1   ;;  %52 = vperm.xlu0 %503, %v45_v2   ;;  %v29_v5 = vld [vmem:[#allocation2] sm:$0xff]  ;;  %v32_v9 = vld [vmem:[#allocation2 + $0x18] sm:$0xff]  ;;  %v48_v10 = vld [vmem:[%s640_s2 + $0x8] sm:$0xff]  ;;  %v50_v44 = vand.u32 127, %v49_v42  ;;  %s567_s2 = smov [#allocation5]  }
  0x16   :  { %v429_v7 = vpack.c.bf16 %v30_v6, %v29_v5  ;;  %v433_v11 = vpack.c.bf16 %v32_v9, %v31_v8  ;;  %v33_v12 = vld [vmem:[#allocation2 + $0x20] sm:$0xff]  ;;  %v34_v13 = vld [vmem:[#allocation2 + $0x28] sm:$0xff]  ;;  %v35_v16 = vld [vmem:[#allocation2 + $0x30] sm:$0xff]  ;;  %s302_s5 = sshll.u32 %s567_s2, 4  ;;  %s303_s5 = int_to_ptr.vmem [resolvable:$true] %s302_s5 }
  0x17   :  { %v437_v14 = vpack.c.bf16 %v34_v13, %v33_v12  ;;  %v36_v17 = vld [vmem:[#allocation2 + $0x38] sm:$0xff]  ;;  %v37_v19 = vld [vmem:[#allocation2 + $0x40] sm:$0xff]  ;;  %v38_v20 = vld [vmem:[#allocation2 + $0x48] sm:$0xff]  ;;  %s534_s6 = scalar_lea.vmem %s303_s5, 128  ;;  %p539_p9 = scmp.lt.s32.totalorder %s303_s5, %s303_s5 }
  0x18   :  { %430 = vmatprep.subr.bf16.mxu0 %v429_v7  ;;  %462 = vmatprep.subr.bf16.mxu1 %v429_v7  ;;  %v441_v18 = vpack.c.bf16 %v36_v17, %v35_v16  ;;  %v445_v22 = vpack.c.bf16 %v38_v20, %v37_v19  ;;  %v39_v23 = vld [vmem:[#allocation2 + $0x50] sm:$0xff]  ;;  %v40_v24 = vld [vmem:[#allocation2 + $0x58] sm:$0xff]  ;;  %v41_v26 = vld [vmem:[#allocation2 + $0x60] sm:$0xff]  ;;  %p535_p8 = scmp.ne.s32.totalorder %s303_s5, %s534_s6  ;;  %p540_p10 = scmp.lt.s32.totalorder %s534_s6, %s534_s6 }
  0x19   :  { %61 = vperm.xlu1 %505, %v614_v3   ;;  %504 = vset.pattern.permute.xlu0 %v564_v4  ;;  %v449_v25 = vpack.c.bf16 %v40_v24, %v39_v23  ;;  %v42_v27 = vld [vmem:[#allocation2 + $0x68] sm:$0xff]  ;;  %v43_v29 = vld [vmem:[#allocation2 + $0x70] sm:$0xff]  ;;  %v44_v30 = vld [vmem:[#allocation2 + $0x78] sm:$0xff] }
  0x1a   :  { %74 = vperm.xlu0 %504, %v45_v2   ;;  %432 = vmatpush3.bf16.msra.mxu0 %v429_v7  ;;  %v453_v28 = vpack.c.bf16 %v42_v27, %v41_v26  ;;  %v457_v31 = vpack.c.bf16 %v44_v30, %v43_v29  ;;  %p541_p11 = por %p540_p10, %p539_p9 }
  0x1b   :  { %464 = vmatpush3.bf16.msra.mxu1 %v429_v7  ;;  %434 = vmatprep.subr.bf16.mxu0 %v433_v11 }
  0x1c   :  { %466 = vmatprep.subr.bf16.mxu1 %v433_v11  ;;  %p542_p12 = pnand %p541_p11, %p535_p8 }
  0x1d   :  { %506 = vset.pattern.permute.xlu1 %v564_v4 }
  0x1e   :  { %77 = vperm.xlu1 %506, %v605_v1   ;;  %82 = vperm.xlu0 %504, %v614_v3  }
  0x1f   :  { %436 = vmatpush3.bf16.msra.mxu0 %v433_v11  ;;  %468 = vmatpush3.bf16.msra.mxu1 %v433_v11 }
  0x20   :  { %438 = vmatprep.subr.bf16.mxu0 %v437_v14  ;;  %470 = vmatprep.subr.bf16.mxu1 %v437_v14 }
  0x22   :  { %507 = vset.pattern.permute.xlu1 %v563_v0  ;;  %86 = vperm.xlu0 %504, %v48_v10  }
  0x23   :  { %66 = vperm.xlu1 %507, %v48_v10   ;;  %440 = vmatpush3.bf16.msra.mxu0 %v437_v14 }
  0x24   :  { %442 = vmatprep.subr.bf16.mxu0 %v441_v18  ;;  %472 = vmatpush3.bf16.msra.mxu1 %v437_v14 }
  0x25   :  { %474 = vmatprep.subr.bf16.mxu1 %v441_v18 }
  0x26   :  { %509 = vset.pattern.permute.xlu0 %v565_v15 }
  0x27   :  { %508 = vset.pattern.permute.xlu1 %v565_v15  ;;  %97 = vperm.xlu0 %509, %v605_v1  }
  0x28   :  { %94 = vperm.xlu1 %508, %v45_v2   ;;  %444 = vmatpush3.bf16.msra.mxu0 %v441_v18 }
  0x29   :  { %476 = vmatpush3.bf16.msra.mxu1 %v441_v18  ;;  %446 = vmatprep.subr.bf16.mxu0 %v445_v22 }
  0x2a   :  { %478 = vmatprep.subr.bf16.mxu1 %v445_v22 }
  0x2b   :  { %510 = vset.pattern.permute.xlu0 %v566_v21 }
  0x2c   :  { %102 = vperm.xlu1 %508, %v614_v3   ;;  %114 = vperm.xlu0 %510, %v45_v2  }
  0x2d   :  { %448 = vmatpush3.bf16.msra.mxu0 %v445_v22  ;;  %480 = vmatpush3.bf16.msra.mxu1 %v445_v22 }
  0x2e   :  { %450 = vmatprep.subr.bf16.mxu0 %v449_v25  ;;  %482 = vmatprep.subr.bf16.mxu1 %v449_v25 }
  0x30   :  { %106 = vperm.xlu1 %508, %v48_v10   ;;  %126 = vperm.xlu0 %510, %v48_v10  }
  0x31   :  { %452 = vmatpush3.bf16.msra.mxu0 %v449_v25  ;;  %484 = vmatpush3.bf16.msra.mxu1 %v449_v25 }
  0x32   :  { %454 = vmatprep.subr.bf16.mxu0 %v453_v28  ;;  %486 = vmatprep.subr.bf16.mxu1 %v453_v28 }
  0x34   :  { %511 = vset.pattern.permute.xlu1 %v566_v21 }
  0x35   :  { %117 = vperm.xlu1 %511, %v605_v1   ;;  %456 = vmatpush3.bf16.msra.mxu0 %v453_v28 }
  0x36   :  { %458 = vmatprep.subr.bf16.mxu0 %v457_v31  ;;  %488 = vmatpush3.bf16.msra.mxu1 %v453_v28 }
  0x37   :  { %490 = vmatprep.subr.bf16.mxu1 %v457_v31 }
  0x39   :  { %122 = vperm.xlu1 %511, %v614_v3   ;;  %460 = vmatpush3.bf16.msra.mxu0 %v457_v31 }
  0x3a   :  { %492 = vmatpush3.bf16.msra.mxu1 %v457_v31 }
  0x94   :  { %v56_v32 = vpop.permute.xlu1 %55  ;;  %v53_v33 = vpop.permute.xlu0 %52 }
  0x95   :  { %vm57_vm1 = vcmp.eq.s32.totalorder %v53_v33, %v50_v44  ;;  %vm58_vm2 = vcmp.eq.s32.totalorder %v56_v32, %v50_v44 }
  0x98   :  { %v62_v34 = vpop.permute.xlu1 %61 }
  0x99   :  { %v75_v35 = vpop.permute.xlu0 %74  ;;  %v69_v51 = vsel %vm57_vm1, %v62_v34, 0.0 }
  0x9a   :  { %vm79_vm0 = vcmp.eq.s32.totalorder %v75_v35, %v50_v44 }
  0x9d   :  { %v78_v36 = vpop.permute.xlu1 %77  ;;  %v83_v37 = vpop.permute.xlu0 %82 }
  0x9e   :  { %vm80_vm3 = vcmp.eq.s32.totalorder %v78_v36, %v50_v44  ;;  %v89_v47 = vsel %vm79_vm0, %v83_v37, 0.0 }
  0x9f   :  { %v91_v54 = vadd.f32 %v89_v47, %v69_v51 }
  0xa1   :  { %v87_v39 = vpop.permute.xlu0 %86 }
  0xa2   :  { %v67_v38 = vpop.permute.xlu1 %66  ;;  %v90_v48 = vsel %vm80_vm3, %v87_v39, 0.0 }
  0xa3   :  { %v70_v49 = vsel %vm58_vm2, %v67_v38, 0.0 }
  0xa4   :  { %v92_v56 = vadd.f32 %v90_v48, %v70_v49 }
  0xa6   :  { %v98_v41 = vpop.permute.xlu0 %97 }
  0xa7   :  { %v95_v40 = vpop.permute.xlu1 %94  ;;  %vm100_vm4 = vcmp.eq.s32.totalorder %v98_v41, %v50_v44 }
  0xa8   :  { %vm99_vm5 = vcmp.eq.s32.totalorder %v95_v40, %v50_v44 }
  0xab   :  { %v103_v43 = vpop.permute.xlu1 %102  ;;  %v115_v46 = vpop.permute.xlu0 %114 }
  0xac   :  { %v109_v52 = vsel %vm99_vm5, %v103_v43, 0.0  ;;  %vm119_vm7 = vcmp.eq.s32.totalorder %v115_v46, %v50_v44 }
  0xad   :  { %v111_v57 = vadd.f32 %v109_v52, %v91_v54 }
  0xaf   :  { %v107_v45 = vpop.permute.xlu1 %106  ;;  %v127_v53 = vpop.permute.xlu0 %126 }
  0xb0   :  { %v110_v55 = vsel %vm100_vm4, %v107_v45, 0.0 }
  0xb1   :  { %v112_v60 = vadd.f32 %v110_v55, %v92_v56 }
  0xb4   :  { %v118_v50 = vpop.permute.xlu1 %117 }
  0xb5   :  { %vm120_vm6 = vcmp.eq.s32.totalorder %v118_v50, %v50_v44 }
  0xb6   :  { %v130_v58 = vsel %vm120_vm6, %v127_v53, 0.0 }
  0xb7   :  { %v132_v63 = vadd.f32 %v130_v58, %v112_v60 }
  0xb8   :  { %v123_v59 = vpop.permute.xlu1 %122 }
  0xb9   :  { %v129_v61 = vsel %vm119_vm7, %v123_v59, 0.0 }
  0xba   :  { %v131_v62 = vadd.f32 %v129_v61, %v111_v57 }
  0xbc   :  { %391 = vmatprep.mubr.f32.mxu0 %v131_v62 }
  0xbd   :  { %392 = vmatmul.mubr.f32.vlgmr.msra.gmra.mrb[0].mxu0 %v132_v63 }
 0x190   :  { %v393_v0 = vpop.f32.mrb[0].mxu0 }
 0x191   :  { %v199_v1 = vpop.f32.mrb[1].mxu0  ;;  %v209_v2 = vadd.f32 %v393_v0, %v132_v63 }
 0x192   :  { %426 = vmatprep.mubr.f32.mxu1 %v199_v1  ;;  %v208_v3 = vadd.f32 %v199_v1, %v131_v62 }
 0x193   :  { %427 = vmatmul.mubr.f32.vlgmr.msra.gmra.mrb[0].mxu1 %v393_v0 }
 0x266   :  { %v428_v4 = vpop.f32.mrb[0].mxu1 }
 0x267   :  { %v286_v5 = vadd.f32 %v428_v4, %v209_v2  ;;  %v276_v6 = vpop.f32.mrb[1].mxu1 }
 0x268   :  { %v285_v7 = vadd.f32 %v276_v6, %v208_v3 }
 0x26a   :  { %v321_v8 = vpack.c.bf16 %v286_v5, %v285_v7 }
 0x26c   :  { %322 = vst [vmem:[#allocation5] sm:$0xff] %v321_v8  }
 0x26d   :  { %545 = shalt.err (!%p542_p12)
}
 0x26e   :  { %s546_s9 = scalar_lea.hbm %s641_s3, 128 }
 0x26f   :  { %p547_p13 = scmp.ne.s32.totalorder %s641_s3, %s546_s9  ;;  %p550_p0 = scmp.lt.u32.totalorder %s546_s9, %s641_s3 }
 0x271   :  { %p552_p1 = pnand %p550_p0, %p547_p13 }
 0x273   :  { %555 = shalt.err (!%p552_p1)
}
 0x274   :  { %s568_s14 = smov 64   ;;  %s569_s15 = smov 4  }
 0x275   :  { %308 = dma.vmem_to_hbm [thread:$0]  %s303_s5, 128, %s641_s3, [#allocation4], %s568_s14, %s568_s14, %s569_s15  }
 0x276   :  { %558 = dma.done.wait [#allocation4], 128  }
 0x277   :  { %559 = vsyncadd [#allocation4], 4294967168 }
 0x278   :  { %312 = vsyncpa [#allocation3], 1 }
 0x279   :  { %313 = vsyncpa [#allocation4], 1 }

</bundles_post_ra>
